<compile_context>
chip_gen: v5e
topology: v5e:2x2
jax: 0.10.0
libtpu: 0.0.40
codegen_flags: <defaults>
</compile_context>

<pallas_src>
import functools
import math

import jax
import jax.numpy as jnp
from jax.experimental import pallas as pl
from jax.experimental.pallas import tpu as pltpu


def _quantize_kernel(y_ref, o_ref, *, factor):
    # Elementwise VPU hot path. Exact divide to match torch.ceil(y*f)/f
    # bit-for-bit; the kernel is HBM-bound so the divide costs nothing.
    y = y_ref[...]
    o_ref[...] = jnp.ceil(y * factor) / factor


def _tpu_generation_params():
    """Returns (tile_bytes_cap, vmem_limit_bytes_or_None, num_tensorcores)."""
    kind = ""
    try:
        kind = jax.devices()[0].device_kind.lower()
    except Exception:
        pass
    if "v7" in kind or "tpu7" in kind:
        # 3.2 TB/s HBM: 8 MiB tiles cut the ~0.35us/step overhead to ~6%.
        # Double-buffered in+out = 32 MiB -> raise scoped limit, still well
        # under the 64 MiB physical VMEM per TensorCore.
        return 8 << 20, 40 << 20, 2
    if "v6" in kind or "tpu6" in kind:
        # 128 MiB physical VMEM; raise limit past the 32 MiB scoped default.
        return 8 << 20, 48 << 20, 1
    # v5e / older / unknown: 2 MiB tiles (8 MiB double-buffered traffic) fit
    # the 16 MiB scoped default; per-step overhead is already only ~7%.
    return 2 << 20, None, 1


def _choose_layout(total, itemsize, tile_bytes_cap, num_tcs):
    """Pick (lanes, rows, row_tile) for a pad-free lane-dense 2D slab.

    Only pad-free reshapes are considered (lanes must divide `total`); the
    last row-block may be partial (masked by Pallas), so no jnp.pad / slice
    copy is ever issued.  Returns None when no lane width in [128, 4096]
    divides the element count.
    """
    sub_mult = max(8, 32 // max(itemsize, 1))  # 8 for f32, 16 for bf16
    best = None  # (tile_elems, lanes, rows, row_tile)
    for lanes in (4096, 2048, 1024, 512, 256, 128):
        if total % lanes:
            continue
        rows = total // lanes
        if rows < sub_mult:
            continue
        cap_rows = max(sub_mult, tile_bytes_cap // (lanes * itemsize))
        row_tile = (min(cap_rows, rows) // sub_mult) * sub_mult
        if row_tile <= 0:
            continue
        cand = (row_tile * lanes, lanes, rows, row_tile)
        if best is None or cand[0] > best[0]:
            best = cand
    if best is None:
        return None

    _, lanes, rows, row_tile = best

    # v7x has 2 TensorCores: make sure mid-size tensors get >= 2 grid steps so
    # the "parallel" axis can shard across both cores.
    if (num_tcs >= 2
            and pl.cdiv(rows, row_tile) == 1
            and total * itemsize > 512 * 1024):
        half = pl.cdiv(pl.cdiv(rows, 2), sub_mult) * sub_mult
        if 0 < half < rows:
            row_tile = half

    return lanes, rows, row_tile


def quantizator(y, B=6, *, min_pallas_bytes=256 * 1024, donate_input=False):
    """JAX/Pallas equivalent of Quantizator.forward (exact semantics)."""
    factor = float((1 << B) - 1)
    orig_shape = y.shape
    total = int(math.prod(orig_shape)) if orig_shape else 1
    itemsize = jnp.dtype(y.dtype).itemsize
    total_bytes = total * itemsize

    # Bypasses (all keep exact forward semantics):
    #  * non-f32/bf16 dtypes: quantization only meaningful for floats,
    #  * tiny tensors: pallas_call launch + pipeline prologue dominate; a
    #    fused XLA elementwise op is strictly faster,
    #  * awkward element counts with no lane-width divisor: fused XLA already
    #    hits the 1-read+1-write roofline (a prefix kernel + tail concat would
    #    only add an extra HBM pass).
    if jnp.dtype(y.dtype) not in (jnp.dtype(jnp.float32), jnp.dtype(jnp.bfloat16)):
        return jnp.ceil(y * factor) / factor
    if total_bytes < min_pallas_bytes:
        return jnp.ceil(y * factor) / factor

    tile_bytes_cap, vmem_limit, num_tcs = _tpu_generation_params()
    layout = _choose_layout(total, itemsize, tile_bytes_cap, num_tcs)
    if layout is None:
        return jnp.ceil(y * factor) / factor
    lanes, rows, row_tile = layout

    y2d = jnp.reshape(y, (rows, lanes))
    grid = (pl.cdiv(rows, row_tile),)
    kernel = functools.partial(_quantize_kernel, factor=factor)

    compiler_kwargs = dict(dimension_semantics=("parallel",))
    if vmem_limit is not None:
        compiler_kwargs["vmem_limit_bytes"] = vmem_limit

    call_kwargs = {}
    if donate_input:
        # Re-use the input HBM buffer for the output (caller must not need y).
        call_kwargs["input_output_aliases"] = {0: 0}

    out2d = pl.pallas_call(
        kernel,
        out_shape=jax.ShapeDtypeStruct((rows, lanes), y2d.dtype),
        grid_spec=pltpu.PrefetchScalarGridSpec(
            num_scalar_prefetch=0,
            grid=grid,
            in_specs=[pl.BlockSpec((row_tile, lanes), lambda i: (i, 0))],
            out_specs=pl.BlockSpec((row_tile, lanes), lambda i: (i, 0)),
        ),
        compiler_params=pltpu.CompilerParams(**compiler_kwargs),
        cost_estimate=pl.CostEstimate(
            flops=2 * total,
            transcendentals=0,
            bytes_accessed=2 * total_bytes,
        ),
        **call_kwargs,
    )(y2d)

    return jnp.reshape(out2d, orig_shape)


def quantizator_ref(y, B=6):
    """Pure-JAX reference matching torch.ceil(y * factor) / factor."""
    factor = float((1 << B) - 1)
    return jnp.ceil(y * factor) / factor


if __name__ == "__main__":
    key = jax.random.PRNGKey(0)
    k1, k2 = jax.random.split(key)

    # Small NCHW bottleneck tensor (the module's typical input).
    x_small = jax.random.normal(k1, (2, 4, 16, 16), dtype=jnp.float32)
    # Shape whose rows are not a multiple of the row tile: exercises the
    # masked partial last block (no padding path exists anymore).
    x_med = jax.random.normal(k2, (3, 5, 24, 128), dtype=jnp.float32)

    # Default call on the small tensor takes the fused-XLA bypass; also force
    # the Pallas path so the kernel itself is exercised.
    out_bypass = quantizator(x_small, B=6)
    out_small = quantizator(x_small, B=6, min_pallas_bytes=0)
    out_med = quantizator(x_med, B=6, min_pallas_bytes=0)
    jax.block_until_ready((out_bypass, out_small, out_med))

    ref_small = quantizator_ref(x_small, B=6)
    ref_med = quantizator_ref(x_med, B=6)

    assert out_small.shape == x_small.shape and out_small.dtype == x_small.dtype
    assert out_med.shape == x_med.shape and out_med.dtype == x_med.dtype
    assert jnp.array_equal(out_bypass, ref_small), "bypass mismatch vs reference"
    assert jnp.array_equal(out_small, ref_small), "pallas (small) mismatch vs reference"
    assert jnp.array_equal(out_med, ref_med), "pallas (partial-block) mismatch vs reference"

    print("KERNEL_OK")
</pallas_src>

<mosaic_0001>
module attributes {stable_mosaic.version = 11 : i64} {
  func.func @_quantize_kernel(%arg0: i32, %arg1: memref<8x256xf32, #tpu.memory_space<vmem>>, %arg2: memref<8x256xf32, #tpu.memory_space<vmem>>) attributes {dimension_semantics = [#tpu.dimension_semantics<parallel>], iteration_bounds = array<i64: 1>, scalar_prefetch = 0 : i64, scratch_operands = 0 : i64, tpu.core_type = #tpu.core_type<tc>, window_params = [{transform_indices = @transform_0, window_bounds = array<i64: 8, 256>}, {transform_indices = @transform_1, window_bounds = array<i64: 8, 256>}]} {
    %c0 = arith.constant 0 : index
    %c0_0 = arith.constant 0 : index
    %0 = vector.load %arg1[%c0, %c0_0] : memref<8x256xf32, #tpu.memory_space<vmem>>, vector<8x256xf32>
    %cst = arith.constant 6.300000e+01 : f32
    %1 = vector.broadcast %cst : f32 to vector<8x256xf32>
    %2 = arith.mulf %0, %1 : vector<8x256xf32>
    %3 = math.ceil %2 : vector<8x256xf32>
    %cst_1 = arith.constant 6.300000e+01 : f32
    %4 = vector.broadcast %cst_1 : f32 to vector<8x256xf32>
    %5 = arith.divf %3, %4 : vector<8x256xf32>
    %c0_2 = arith.constant 0 : index
    %c0_3 = arith.constant 0 : index
    %6 = vector.load %arg2[%c0_2, %c0_3] : memref<8x256xf32, #tpu.memory_space<vmem>>, vector<8x256xf32>
    tpu.vector_store %arg2[%c0_2, %c0_3], %5 {strides = array<i32>} : memref<8x256xf32, #tpu.memory_space<vmem>>, vector<8x256xf32>,
    return
  }
  func.func @transform_0(%arg0: i32) -> (i32, i32) {
    %c0_i32 = arith.constant 0 : i32
    %c0_i32_0 = arith.constant 0 : i32
    return %arg0, %c0_i32 : i32, i32
  }
  func.func @transform_1(%arg0: i32) -> (i32, i32) {
    %c0_i32 = arith.constant 0 : i32
    %c0_i32_0 = arith.constant 0 : i32
    return %arg0, %c0_i32 : i32, i32
  }
}

</mosaic_0001>

<bundles_post_ra>
// kernel: tpu_custom_call.1
= control target key start
LH: loop header
LB: loop body
LE: loop exit
PB: predicated region body
PF: predicated region fallthrough
CT: control target
= control target key end

     0   :  { %6 = vsyncpa [#allocation3], 0  ;;  %s133_s0 = inlined_call_operand.hbm [shape: f32[8,256], index: 0, kind: input, shape index: {}]   ;;  %s134_s1 = inlined_call_operand.hbm [shape: f32[8,256], index: 1, kind: output, shape index: {}]  }
   0x1   :  { %7 = vsyncpa [#allocation4], 0  ;;  %s13_s8 = sshll.u32 %s133_s0, 4  ;;  %s114_s9 = smov [#allocation2]   ;;  %s14_s8 = int_to_ptr.hbm [resolvable:$true] %s13_s8 }
   0x2   :  { %s15_s10 = sshll.u32 %s114_s9, 4  ;;  %s16_s10 = int_to_ptr.vmem [resolvable:$true] %s15_s10 }
   0x3   :  { %18 = dma.hbm_to_vmem [thread:$0]  %s14_s8, 256, %s16_s10, [#allocation3]  }
   0x4   :  { %110 = dma.done.wait [#allocation3], 256  }
   0x5   :  { %111 = vsyncadd [#allocation3], 4294967040  ;;  %v115_v0 = vmov 63.0   ;;  %v23_v2 = vld [vmem:[#allocation2] sm:$0xff]  ;;  %v24_v3 = vld [vmem:[#allocation2 + $0x8] sm:$0xff]  ;;  %s116_s0 = smov [#allocation5]  }
   0x6   :  { %60 = vrcp.f32 %v115_v0  ;;  %v25_v5 = vmul.f32 63.0, %v23_v2  ;;  %v26_v6 = vmul.f32 63.0, %v24_v3  ;;  %s45_s11 = sshll.u32 %s116_s0, 4  ;;  %s47_s14 = sshll.u32 %s134_s1, 4  ;;  %s46_s11 = int_to_ptr.vmem [resolvable:$true] %s45_s11  ;;  %s48_s14 = int_to_ptr.hbm [resolvable:$true] %s47_s14 }
   0x8   :  { %v27_v9 = vceil.f32 %v25_v5  ;;  %v28_v10 = vceil.f32 %v26_v6 }
   0xc   :  { %v61_v1 = vpop.eup %60 }
   0xd   :  { %v30_v4 = vmul.f32 63.0, %v61_v1  ;;  %vm34_vm0 = vweird.f32 %v61_v1 }
   0xf   :  { %v31_v7 = vsub.f32 1.0, %v30_v4 }
  0x11   :  { %v32_v8 = vmul.f32 %v61_v1, %v31_v7 }
  0x13   :  { %v33_v11 = vadd.f32 %v61_v1, %v32_v8 }
  0x15   :  { %v35_v12 = vsel %vm34_vm0, %v61_v1, %v33_v11 }
  0x16   :  { %v36_v13 = vmul.f32 %v35_v12, %v27_v9  ;;  %v37_v14 = vmul.f32 %v35_v12, %v28_v10 }
  0x18   :  { %38 = vst [vmem:[#allocation5] sm:$0xff] %v36_v13 }
  0x19   :  { %39 = vst [vmem:[#allocation5 + $0x8] sm:$0xff] %v37_v14 }
  0x1a   :  { %50 = dma.vmem_to_hbm [thread:$0]  %s46_s11, 256, %s48_s14, [#allocation4]  }
  0x1b   :  { %112 = dma.done.wait [#allocation4], 256  }
  0x1c   :  { %113 = vsyncadd [#allocation4], 4294967040 }
  0x1d   :  { %55 = vsyncpa [#allocation3], 1 }
  0x1e   :  { %56 = vsyncpa [#allocation4], 1 }

</bundles_post_ra>
